<compile_context>
chip_gen: v6e
topology: v6e:2x2x1
jax: 0.10.0
libtpu: 0.0.40
codegen_flags: <defaults>
</compile_context>

<pallas_src>
import functools

import jax
import jax.numpy as jnp
from jax.experimental import pallas as pl
from jax.experimental.pallas import tpu as pltpu

LANE = 128                        # lane width
ACC_ROWS = 64                     # 8 independent (8,128) f32 accumulator slabs
TILE_BYTES = 4 * 1024 * 1024      # per-input per-step DMA tile budget (4 MiB)
MAX_TILE_ROWS = 16384             # cap -> bounds in-kernel f32 temporaries
VMEM_LIMIT_BYTES = 48 * 1024 * 1024


def _round_down(x, m):
    return (x // m) * m


@functools.lru_cache(maxsize=None)
def _num_tensorcores():
    """TensorCores per device (2 on v7x, 1 on v5e/v6e).

    Conservative: returns 1 unless a 2-TC chip can be positively identified,
    so single-core chips never see the core-parallel path.
    """
    try:
        info = pltpu.get_tpu_info()
        for name in ("num_cores", "core_count", "num_tensorcores",
                     "tensor_core_count", "cores_per_chip"):
            v = getattr(info, name, None)
            if isinstance(v, int) and v in (1, 2):
                return v
    except Exception:
        pass
    try:
        kind = jax.devices()[0].device_kind.lower()
        if "v7" in kind:
            return 2
    except Exception:
        pass
    return 1


def _partial_sum_kernel(yt_ref, yp_ref, out_ref, *, rows, tm, acc_rows, bpc,
                        two_axes):
    """Accumulate sum((yt - yp)^2) into a per-core (acc_rows, 128) slab."""
    if two_axes:
        c = pl.program_id(0)          # TensorCore split (v7x)
        i = pl.program_id(1)          # block within this core's range
        step = c * bpc + i            # logical block index (may exceed last)
    else:
        i = pl.program_id(0)
        step = i

    @pl.when(i == 0)
    def _init():
        out_ref[...] = jnp.zeros(out_ref.shape, out_ref.dtype)

    # Rows of this block that lie inside the real array (<= 0 for clamped
    # duplicate blocks the 2-core split may issue; partial for the ragged
    # last block).  Masking is applied unconditionally — it is pure VALU
    # work hidden under the HBM stream.
    rem = rows - step * tm
    row = jax.lax.broadcasted_iota(jnp.int32, (tm, 1), 0)

    d = yt_ref[...].astype(jnp.float32) - yp_ref[...].astype(jnp.float32)
    sq = jnp.where(row < rem, d * d, jnp.float32(0.0))

    # tm // acc_rows independent slab-adds -> short, ILP-friendly chains,
    # accumulated directly into the VMEM-resident output block.
    out_ref[0] += jnp.sum(sq.reshape(tm // acc_rows, acc_rows, LANE), axis=0)


def _sum_sq_diff_prefix(yt2, yp2):
    """Partial sums of (yt2 - yp2)^2 over a (rows, 128) slab.

    Returns an (ncores, acc_rows, 128) f32 array of partial sums.
    """
    rows = yt2.shape[0]

    itemsize = max(jnp.dtype(yt2.dtype).itemsize, jnp.dtype(yp2.dtype).itemsize)
    budget_rows = min(_round_down(TILE_BYTES // (LANE * itemsize), ACC_ROWS),
                      MAX_TILE_ROWS)

    if rows >= ACC_ROWS:
        acc_rows = ACC_ROWS
        tm = min(budget_rows, _round_down(rows, ACC_ROWS))   # mult of 64, <= rows
    else:
        acc_rows = rows
        tm = rows                                            # single full-extent block

    nblocks = pl.cdiv(rows, tm)
    ncores = min(_num_tensorcores(), nblocks)
    bpc = pl.cdiv(nblocks, ncores)            # blocks per core

    kernel = functools.partial(_partial_sum_kernel, rows=rows, tm=tm,
                               acc_rows=acc_rows, bpc=bpc,
                               two_axes=(ncores > 1))

    bytes_in = yt2.size * yt2.dtype.itemsize + yp2.size * yp2.dtype.itemsize
    cost = pl.CostEstimate(flops=4 * yt2.size, transcendentals=0,
                           bytes_accessed=bytes_in + ncores * acc_rows * LANE * 4)

    if ncores > 1:
        def in_map(c, i):
            # Clamp duplicate steps on the second core to a legal block; their
            # contribution is masked to zero inside the kernel (rem <= 0).
            return (jnp.minimum(c * bpc + i, nblocks - 1), 0)
        grid = (ncores, bpc)
        out_map = lambda c, i: (c, 0, 0)
        semantics = (pltpu.CORE_PARALLEL, pltpu.ARBITRARY)
    else:
        def in_map(i):
            return (i, 0)
        grid = (nblocks,)
        out_map = lambda i: (0, 0, 0)
        semantics = (pltpu.ARBITRARY,)

    return pl.pallas_call(
        kernel,
        out_shape=jax.ShapeDtypeStruct((ncores, acc_rows, LANE), jnp.float32),
        grid=grid,
        in_specs=[pl.BlockSpec((tm, LANE), in_map),     # y_true tile (native dtype)
                  pl.BlockSpec((tm, LANE), in_map)],    # y_pred tile (native dtype)
        out_specs=pl.BlockSpec((1, acc_rows, LANE), out_map),
        compiler_params=pltpu.CompilerParams(
            dimension_semantics=semantics,
            vmem_limit_bytes=VMEM_LIMIT_BYTES),
        cost_estimate=cost,
    )(yt2, yp2)


@jax.jit
def nrmse_pallas(y_true, y_pred, factor):
    assert y_true.shape == y_pred.shape
    n = y_true.size
    flat_t = y_true.reshape(-1)
    flat_p = y_pred.reshape(-1)
    rows = n // LANE
    lead = rows * LANE

    total = jnp.float32(0.0)
    if rows > 0:
        # For n % 128 == 0 (the common case) this slicing/reshape is
        # metadata-only — inputs are streamed zero-copy in native dtype.
        partials = _sum_sq_diff_prefix(flat_t[:lead].reshape(rows, LANE),
                                       flat_p[:lead].reshape(rows, LANE))
        total = total + jnp.sum(partials, dtype=jnp.float32)
    if lead < n:
        # < 128-element ragged tail: tiny, fuses into the jit epilogue.
        dt = flat_t[lead:].astype(jnp.float32) - flat_p[lead:].astype(jnp.float32)
        total = total + jnp.sum(dt * dt, dtype=jnp.float32)

    inv_count = jnp.float32(1.0 / n)   # n is static: full-precision reciprocal
    rmse = jnp.sqrt(total * inv_count)
    return rmse / jnp.asarray(factor, jnp.float32)


class NRMSE:
    """Mirror of the PyTorch module; factor derived from the dataset at init."""

    def __init__(self, total_dataset):
        self.factor = jnp.max(total_dataset) - jnp.min(total_dataset)

    def __call__(self, y_true, y_pred):
        return nrmse_pallas(y_true, y_pred, self.factor)


if __name__ == "__main__":
    key = jax.random.PRNGKey(0)
    k1, k2, k3 = jax.random.split(key, 3)

    # Small NCHW shapes consistent with a CAE image loss.
    shape = (2, 4, 16, 16)
    total_dataset = jax.random.uniform(k1, (8,) + shape[1:], jnp.float32,
                                       minval=-1.0, maxval=3.0)
    y_true = jax.random.normal(k2, shape, jnp.float32)
    y_pred = y_true + 0.1 * jax.random.normal(k3, shape, jnp.float32)

    loss_mod = NRMSE(total_dataset)
    out = loss_mod(y_true, y_pred)
    jax.block_until_ready(out)

    # Pure-JAX reference check.
    factor = jnp.max(total_dataset) - jnp.min(total_dataset)
    ref = jnp.sqrt(jnp.mean((y_true - y_pred) ** 2)) / factor
    assert jnp.allclose(out, ref, rtol=1e-5, atol=1e-6), (out, ref)

    print("KERNEL_OK")
</pallas_src>

<mosaic_0001>
module attributes {stable_mosaic.version = 11 : i64} {
  func.func @_partial_sum_kernel(%arg0: i32, %arg1: memref<16x128xf32, #tpu.memory_space<vmem>>, %arg2: memref<16x128xf32, #tpu.memory_space<vmem>>, %arg3: memref<1x16x128xf32, #tpu.memory_space<vmem>>) attributes {dimension_semantics = [#tpu.dimension_semantics<arbitrary>], iteration_bounds = array<i64: 1>, scalar_prefetch = 0 : i64, scratch_operands = 0 : i64, tpu.core_type = #tpu.core_type<tc>, window_params = [{transform_indices = @transform_0, window_bounds = array<i64: 16, 128>}, {transform_indices = @transform_1, window_bounds = array<i64: 16, 128>}, {pipeline_mode = #tpu.pipeline_mode<synchronous>, transform_indices = @transform_2, window_bounds = array<i64: 1, 16, 128>}]} {
    %c0_i32 = arith.constant 0 : i32
    %0 = arith.cmpi eq, %arg0, %c0_i32 : i32
    %1 = arith.extui %0 : i1 to i32
    %c0_i32_0 = arith.constant 0 : i32
    %2 = arith.cmpi ne, %1, %c0_i32_0 : i32
    scf.if %2 {
      %cst_12 = arith.constant 0.000000e+00 : f32
      %24 = vector.broadcast %cst_12 : f32 to vector<1x16x128xf32>
      %c0_13 = arith.constant 0 : index
      %c0_14 = arith.constant 0 : index
      %c0_15 = arith.constant 0 : index
      %25 = vector.load %arg3[%c0_13, %c0_14, %c0_15] : memref<1x16x128xf32, #tpu.memory_space<vmem>>, vector<1x16x128xf32>
      tpu.vector_store %arg3[%c0_13, %c0_14, %c0_15], %24 {strides = array<i32>} : memref<1x16x128xf32, #tpu.memory_space<vmem>>, vector<1x16x128xf32>,
    } else {
    }
    %c16_i32 = arith.constant 16 : i32
    %3 = arith.muli %arg0, %c16_i32 : i32
    %c16_i32_1 = arith.constant 16 : i32
    %4 = arith.subi %c16_i32_1, %3 : i32
    %5 = tpu.iota {dimensions = array<i32: 0>} : vector<16x1xi32>
    %c0 = arith.constant 0 : index
    %c0_2 = arith.constant 0 : index
    %6 = vector.load %arg1[%c0, %c0_2] : memref<16x128xf32, #tpu.memory_space<vmem>>, vector<16x128xf32>
    %c0_3 = arith.constant 0 : index
    %c0_4 = arith.constant 0 : index
    %7 = vector.load %arg2[%c0_3, %c0_4] : memref<16x128xf32, #tpu.memory_space<vmem>>, vector<16x128xf32>
    %8 = arith.subf %6, %7 : vector<16x128xf32>
    %9 = vector.broadcast %4 : i32 to vector<16x1xi32>
    %10 = arith.cmpi slt, %5, %9 : vector<16x1xi32>
    %11 = arith.mulf %8, %8 : vector<16x128xf32>
    %cst = arith.constant 0.000000e+00 : f32
    %12 = vector.shape_cast %10 : vector<16x1xi1> to vector<16x1xi1>
    %13 = vector.broadcast %12 : vector<16x1xi1> to vector<16x128xi1>
    %14 = vector.broadcast %cst : f32 to vector<16x128xf32>
    %15 = arith.select %13, %11, %14 : vector<16x128xi1>, vector<16x128xf32>
    %c0_5 = arith.constant 0 : index
    %c0_6 = arith.constant 0 : index
    %c0_7 = arith.constant 0 : index
    %16 = vector.load %arg3[%c0_5, %c0_6, %c0_7] : memref<1x16x128xf32, #tpu.memory_space<vmem>>, vector<1x16x128xf32>
    %17 = vector.shape_cast %16 : vector<1x16x128xf32> to vector<16x128xf32>
    %18 = vector.shape_cast %15 : vector<16x128xf32> to vector<1x16x128xf32>
    %cst_8 = arith.constant dense<0.000000e+00> : vector<16x128xf32>
    %19 = vector.multi_reduction <add>, %18, %cst_8 [0] : vector<1x16x128xf32> to vector<16x128xf32>
    %20 = arith.addf %17, %19 : vector<16x128xf32>
    %c0_9 = arith.constant 0 : index
    %c0_10 = arith.constant 0 : index
    %c0_11 = arith.constant 0 : index
    %21 = vector.load %arg3[%c0_9, %c0_10, %c0_11] : memref<1x16x128xf32, #tpu.memory_space<vmem>>, vector<1x16x128xf32>
    %22 = vector.shape_cast %21 : vector<1x16x128xf32> to vector<16x128xf32>
    %23 = vector.shape_cast %20 : vector<16x128xf32> to vector<1x16x128xf32>
    tpu.vector_store %arg3[%c0_9, %c0_10, %c0_11], %23 {strides = array<i32>} : memref<1x16x128xf32, #tpu.memory_space<vmem>>, vector<1x16x128xf32>,
    return
  }
  func.func @transform_0(%arg0: i32) -> (i32, i32) {
    %c0_i32 = arith.constant 0 : i32
    %c0_i32_0 = arith.constant 0 : i32
    return %arg0, %c0_i32 : i32, i32
  }
  func.func @transform_1(%arg0: i32) -> (i32, i32) {
    %c0_i32 = arith.constant 0 : i32
    %c0_i32_0 = arith.constant 0 : i32
    return %arg0, %c0_i32 : i32, i32
  }
  func.func @transform_2(%arg0: i32) -> (i32, i32, i32) {
    %c0_i32 = arith.constant 0 : i32
    %c0_i32_0 = arith.constant 0 : i32
    %c0_i32_1 = arith.constant 0 : i32
    %c0_i32_2 = arith.constant 0 : i32
    return %c0_i32, %c0_i32_0, %c0_i32_1 : i32, i32, i32
  }
}

</mosaic_0001>

<bundles_post_ra>
// kernel: nrmse_pallas.1
= control target key start
LH: loop header
LB: loop body
LE: loop exit
PB: predicated region body
PF: predicated region fallthrough
CT: control target
= control target key end

     0   :  { %s85_s0 = inlined_call_operand.vmem [shape: f32[16,128], index: 0, kind: input, shape index: {}]   ;;  %s86_s1 = inlined_call_operand.vmem [shape: f32[16,128], index: 1, kind: input, shape index: {}]   ;;  %s87_s2 = inlined_call_operand.vmem [shape: f32[1,16,128], index: 2, kind: output, shape index: {}]  }
   0x1   :  { %v22_v0 = vld [vmem:[%s85_s0] sm:$0xff]  ;;  %v23_v2 = vld [vmem:[%s85_s0 + $0x8] sm:$0xff] }
   0x2   :  { %v24_v1 = vld [vmem:[%s86_s1] sm:$0xff]  ;;  %v25_v4 = vld [vmem:[%s86_s1 + $0x8] sm:$0xff] }
   0x3   :  { %v26_v3 = vsub.f32 %v22_v0, %v24_v1  ;;  %v27_v5 = vsub.f32 %v23_v2, %v25_v4 }
   0x5   :  { %v31_v6 = vmul.f32 %v26_v3, %v26_v3  ;;  %v32_v7 = vmul.f32 %v27_v5, %v27_v5 }
   0x7   :  { %45 = vst [vmem:[%s87_s2] sm:$0xff] %v31_v6  ;;  %46 = vst [vmem:[%s87_s2 + $0x8] sm:$0xff] %v32_v7 }

</bundles_post_ra>
